<compile_context>
chip_gen: v7x
topology: tpu7x:2x2x1
jax: 0.10.0
libtpu: 0.0.40
codegen_flags: <defaults>
</compile_context>

<pallas_src>
import jax
import jax.numpy as jnp
from jax.experimental import pallas as pl
from jax.experimental.pallas import tpu as pltpu

HIDDEN = 32  # matches nn.LSTM(hidden_size=32)


def _lstm_fc_kernel(x_ref,    # (T, B, 1)   f32   time-major input
                    w_ref,    # (2H, 8H)    bf16  skewed fused recurrent weight
                    p_ref,    # (8, 4H)     f32   packed small params
                    out_ref): # (B, 1)      f32
    T, B, _ = x_ref.shape
    H = HIDDEN
    G = 4 * H  # 128 lanes per layer's gate block

    # Packed small parameters (single VMEM tile).
    wih0 = p_ref[0:1, :]        # layer-0 W_ih^T         (1, 4H)
    b0 = p_ref[1:2, :]          # layer-0 b_ih + b_hh    (1, 4H)
    b1 = p_ref[2:3, :]          # layer-1 b_ih + b_hh    (1, 4H)
    fcw = p_ref[3:4, 0:H]       # fc.weight              (1, H)
    fcb = p_ref[4:5, 0:1]       # fc.bias                (1, 1)

    w = w_ref[...]              # (2H, 8H) bf16, staged once

    # Hoisted layer-0 input projection for all timesteps (off the serial path):
    # (T,B,1) * (1,4H) + (1,4H) -> (T,B,4H). K=1 "matmul" == VPU broadcast mul.
    gates0_all = x_ref[...] * wih0 + b0

    def cell_tail(gates, c):
        # Full-vreg activations (one sigmoid + one tanh over all 4H lanes),
        # then 32-lane slices in the PyTorch i, f, g, o gate order. f32 tail.
        sig = jax.nn.sigmoid(gates)
        th = jnp.tanh(gates)
        i = sig[:, 0:H]
        f = sig[:, H:2 * H]
        o = sig[:, 3 * H:4 * H]
        g = th[:, 2 * H:3 * H]
        c_new = f * c + i * g
        h_new = o * jnp.tanh(c_new)
        return h_new, c_new

    zeros = jnp.zeros((B, H), jnp.float32)   # h0 = c0 = 0, matching torch.zeros

    # Prologue: layer-0 step 0 needs no matmul (h1_{-1} = 0 => recurrence = 0).
    h1, c1 = cell_tail(gates0_all[0], zeros)     # h1 at time 0
    h2, c2 = zeros, zeros                        # h2 at time -1

    # Skewed recurrence, fully unrolled: one fused MXU matmul per timestep.
    for t in range(T):
        # LHS = [h1_t | h2_{t-1}]  (B, 2H), bf16 operand, f32 accumulation.
        hcat = jnp.concatenate([h1, h2], axis=1).astype(jnp.bfloat16)
        rec = jnp.dot(hcat, w, preferred_element_type=jnp.float32)  # (B, 8H) f32

        # Layer-1 tail for step t: cols 4H:8H already hold
        # h1_t @ Wih1^T + h2_{t-1} @ Whh1^T (summed inside the MXU contraction).
        h2, c2 = cell_tail(rec[:, G:2 * G] + b1, c2)

        # Layer-0 tail for step t+1 (independent of the layer-1 tail above).
        if t + 1 < T:
            h1, c1 = cell_tail(gates0_all[t + 1] + rec[:, 0:G], c1)

    # fc(out[:, -1, :]) -> (B, 1): VPU multiply + lane reduction (N=1, skip MXU).
    out_ref[...] = jnp.sum(h2 * fcw, axis=1, keepdims=True) + fcb


def net_forward(x, params):
    """x: (B, T, 1) float32 (batch-first, like the PyTorch module)."""
    B, T, _ = x.shape
    # Time-major layout for free per-step leading-axis indexing in the kernel;
    # this transpose is negligible at these sizes.
    x_tm = jnp.transpose(x, (1, 0, 2))

    vmem = pl.BlockSpec(memory_space=pltpu.MemorySpace.VMEM)
    return pl.pallas_call(
        _lstm_fc_kernel,
        out_shape=jax.ShapeDtypeStruct((B, 1), jnp.float32),
        in_specs=[vmem, vmem, vmem],
        out_specs=vmem,
    )(x_tm, params["w_fused"], params["p_small"])


def init_params(key):
    """Deterministic synthetic parameters with PyTorch-like U(-1/sqrt(H), 1/sqrt(H)) init,
    pre-packed into the kernel's fused layouts."""
    H = HIDDEN
    bound = 1.0 / jnp.sqrt(H)
    keys = jax.random.split(key, 10)

    def u(k, shape):
        return jax.random.uniform(k, shape, jnp.float32, -bound, bound)

    wih0 = u(keys[0], (1, 4 * H))                            # layer-0 W_ih^T (input=1)
    whh0 = u(keys[1], (H, 4 * H))                            # layer-0 W_hh^T
    b0 = u(keys[2], (1, 4 * H)) + u(keys[3], (1, 4 * H))     # layer-0 b_ih + b_hh
    wih1 = u(keys[4], (H, 4 * H))                            # layer-1 W_ih^T
    whh1 = u(keys[5], (H, 4 * H))                            # layer-1 W_hh^T
    b1 = u(keys[6], (1, 4 * H)) + u(keys[7], (1, 4 * H))     # layer-1 b_ih + b_hh
    fcw = u(keys[8], (1, H))                                 # fc.weight (out=1, in=H)
    fcb = u(keys[9], (1, 1))                                 # fc.bias

    # Skewed fused recurrent weight (2H, 8H) for LHS = [h1_t | h2_{t-1}]:
    #   [[Whh0^T, Wih1^T],
    #    [  0   , Whh1^T]]
    # cols 0:4H  -> layer-0 recurrence for step t+1
    # cols 4H:8H -> layer-1 input-proj(h1_t) + recurrence(h2_{t-1}) for step t
    w = jnp.zeros((2 * H, 8 * H), jnp.float32)
    w = w.at[:H, :4 * H].set(whh0)
    w = w.at[:H, 4 * H:].set(wih1)
    w = w.at[H:, 4 * H:].set(whh1)
    w_fused = w.astype(jnp.bfloat16)   # bf16 MXU operand; accumulation stays f32

    # Pack all small row-parameters into one (8, 4H)=(8, 128) VMEM tile (1 DMA).
    p = jnp.zeros((8, 4 * H), jnp.float32)
    p = p.at[0, :].set(wih0[0])
    p = p.at[1, :].set(b0[0])
    p = p.at[2, :].set(b1[0])
    p = p.at[3, :H].set(fcw[0])
    p = p.at[4, 0].set(fcb[0, 0])

    return {"w_fused": w_fused, "p_small": p}


if __name__ == "__main__":
    key = jax.random.PRNGKey(0)
    pkey, xkey = jax.random.split(key)

    params = init_params(pkey)

    B, T = 2, 8
    x = jax.random.normal(xkey, (B, T, 1), jnp.float32)   # (batch, seq, input=1)

    out = net_forward(x, params)
    jax.block_until_ready(out)
    assert out.shape == (B, 1)
    print("KERNEL_OK")
</pallas_src>

<mosaic_0001>
module attributes {stable_mosaic.version = 11 : i64} {
  func.func @_lstm_fc_kernel(%arg0: memref<8x2x1xf32, #tpu.memory_space<vmem>>, %arg1: memref<64x256xbf16, #tpu.memory_space<vmem>>, %arg2: memref<8x128xf32, #tpu.memory_space<vmem>>, %arg3: memref<2x1xf32, #tpu.memory_space<vmem>>) attributes {dimension_semantics = [], scalar_prefetch = 0 : i64, scratch_operands = 0 : i64, tpu.core_type = #tpu.core_type<tc>} {
    %c0 = arith.constant 0 : index
    %c0_0 = arith.constant 0 : index
    %0 = vector.load %arg2[%c0, %c0_0] : memref<8x128xf32, #tpu.memory_space<vmem>>, vector<1x128xf32>
    %c1 = arith.constant 1 : index
    %c0_1 = arith.constant 0 : index
    %1 = vector.load %arg2[%c1, %c0_1] : memref<8x128xf32, #tpu.memory_space<vmem>>, vector<1x128xf32>
    %c2 = arith.constant 2 : index
    %c0_2 = arith.constant 0 : index
    %2 = vector.load %arg2[%c2, %c0_2] : memref<8x128xf32, #tpu.memory_space<vmem>>, vector<1x128xf32>
    %c3 = arith.constant 3 : index
    %c0_3 = arith.constant 0 : index
    %3 = vector.load %arg2[%c3, %c0_3] : memref<8x128xf32, #tpu.memory_space<vmem>>, vector<1x32xf32>
    %c4 = arith.constant 4 : index
    %c0_4 = arith.constant 0 : index
    %4 = vector.load %arg2[%c4, %c0_4] : memref<8x128xf32, #tpu.memory_space<vmem>>, vector<1x1xf32>
    %c0_5 = arith.constant 0 : index
    %c0_6 = arith.constant 0 : index
    %5 = vector.load %arg1[%c0_5, %c0_6] : memref<64x256xbf16, #tpu.memory_space<vmem>>, vector<64x256xbf16>
    %c0_7 = arith.constant 0 : index
    %c0_8 = arith.constant 0 : index
    %c0_9 = arith.constant 0 : index
    %6 = vector.load %arg0[%c0_7, %c0_8, %c0_9] : memref<8x2x1xf32, #tpu.memory_space<vmem>>, vector<8x2x1xf32>
    %7 = vector.shape_cast %0 : vector<1x128xf32> to vector<1x1x128xf32>
    %8 = vector.broadcast %6 : vector<8x2x1xf32> to vector<8x2x128xf32>
    %9 = vector.broadcast %7 : vector<1x1x128xf32> to vector<8x2x128xf32>
    %10 = arith.mulf %8, %9 : vector<8x2x128xf32>
    %11 = vector.shape_cast %1 : vector<1x128xf32> to vector<1x1x128xf32>
    %12 = vector.broadcast %11 : vector<1x1x128xf32> to vector<8x2x128xf32>
    %13 = arith.addf %10, %12 : vector<8x2x128xf32>
    %cst = arith.constant 0.000000e+00 : f32
    %14 = vector.broadcast %cst : f32 to vector<2x32xf32>
    %15 = vector.extract_strided_slice %13 {offsets = [0, 0, 0], sizes = [1, 2, 128], strides = [1, 1, 1]} : vector<8x2x128xf32> to vector<1x2x128xf32>
    %16 = vector.shape_cast %15 : vector<1x2x128xf32> to vector<2x128xf32>
    %17 = arith.negf %16 : vector<2x128xf32>
    %18 = math.exp %17 : vector<2x128xf32>
    %cst_10 = arith.constant 1.000000e+00 : f32
    %19 = vector.broadcast %cst_10 : f32 to vector<2x128xf32>
    %20 = arith.addf %19, %18 : vector<2x128xf32>
    %21 = arith.divf %19, %20 : vector<2x128xf32>
    %22 = math.tanh %16 : vector<2x128xf32>
    %23 = vector.extract_strided_slice %21 {offsets = [0, 0], sizes = [2, 32], strides = [1, 1]} : vector<2x128xf32> to vector<2x32xf32>
    %24 = vector.extract_strided_slice %21 {offsets = [0, 32], sizes = [2, 32], strides = [1, 1]} : vector<2x128xf32> to vector<2x32xf32>
    %25 = vector.extract_strided_slice %21 {offsets = [0, 96], sizes = [2, 32], strides = [1, 1]} : vector<2x128xf32> to vector<2x32xf32>
    %26 = vector.extract_strided_slice %22 {offsets = [0, 64], sizes = [2, 32], strides = [1, 1]} : vector<2x128xf32> to vector<2x32xf32>
    %27 = arith.mulf %24, %14 : vector<2x32xf32>
    %28 = arith.mulf %23, %26 : vector<2x32xf32>
    %29 = arith.addf %27, %28 : vector<2x32xf32>
    %30 = math.tanh %29 : vector<2x32xf32>
    %31 = arith.mulf %25, %30 : vector<2x32xf32>
    %32 = tpu.concatenate %31, %14 in 1 : vector<2x32xf32>, vector<2x32xf32> -> vector<2x64xf32>
    %33 = arith.truncf %32 : vector<2x64xf32> to vector<2x64xbf16>
    %cst_11 = arith.constant dense<0.000000e+00> : vector<2x256xf32>
    %34 = tpu.matmul %33, %5, %cst_11 {dimension_numbers = #tpu.dot_dimension_numbers<[1], [0], [0], [1], [0, 0, 1, 1], [], []>} : vector<2x64xbf16>, vector<64x256xbf16>, vector<2x256xf32> -> vector<2x256xf32>
    %35 = vector.extract_strided_slice %34 {offsets = [0, 128], sizes = [2, 128], strides = [1, 1]} : vector<2x256xf32> to vector<2x128xf32>
    %36 = vector.broadcast %2 : vector<1x128xf32> to vector<2x128xf32>
    %37 = arith.addf %35, %36 : vector<2x128xf32>
    %38 = arith.negf %37 : vector<2x128xf32>
    %39 = math.exp %38 : vector<2x128xf32>
    %cst_12 = arith.constant 1.000000e+00 : f32
    %40 = vector.broadcast %cst_12 : f32 to vector<2x128xf32>
    %41 = arith.addf %40, %39 : vector<2x128xf32>
    %42 = arith.divf %40, %41 : vector<2x128xf32>
    %43 = math.tanh %37 : vector<2x128xf32>
    %44 = vector.extract_strided_slice %42 {offsets = [0, 0], sizes = [2, 32], strides = [1, 1]} : vector<2x128xf32> to vector<2x32xf32>
    %45 = vector.extract_strided_slice %42 {offsets = [0, 32], sizes = [2, 32], strides = [1, 1]} : vector<2x128xf32> to vector<2x32xf32>
    %46 = vector.extract_strided_slice %42 {offsets = [0, 96], sizes = [2, 32], strides = [1, 1]} : vector<2x128xf32> to vector<2x32xf32>
    %47 = vector.extract_strided_slice %43 {offsets = [0, 64], sizes = [2, 32], strides = [1, 1]} : vector<2x128xf32> to vector<2x32xf32>
    %48 = arith.mulf %45, %14 : vector<2x32xf32>
    %49 = arith.mulf %44, %47 : vector<2x32xf32>
    %50 = arith.addf %48, %49 : vector<2x32xf32>
    %51 = math.tanh %50 : vector<2x32xf32>
    %52 = arith.mulf %46, %51 : vector<2x32xf32>
    %53 = vector.extract_strided_slice %13 {offsets = [1, 0, 0], sizes = [1, 2, 128], strides = [1, 1, 1]} : vector<8x2x128xf32> to vector<1x2x128xf32>
    %54 = vector.shape_cast %53 : vector<1x2x128xf32> to vector<2x128xf32>
    %55 = vector.extract_strided_slice %34 {offsets = [0, 0], sizes = [2, 128], strides = [1, 1]} : vector<2x256xf32> to vector<2x128xf32>
    %56 = arith.addf %54, %55 : vector<2x128xf32>
    %57 = arith.negf %56 : vector<2x128xf32>
    %58 = math.exp %57 : vector<2x128xf32>
    %cst_13 = arith.constant 1.000000e+00 : f32
    %59 = vector.broadcast %cst_13 : f32 to vector<2x128xf32>
    %60 = arith.addf %59, %58 : vector<2x128xf32>
    %61 = arith.divf %59, %60 : vector<2x128xf32>
    %62 = math.tanh %56 : vector<2x128xf32>
    %63 = vector.extract_strided_slice %61 {offsets = [0, 0], sizes = [2, 32], strides = [1, 1]} : vector<2x128xf32> to vector<2x32xf32>
    %64 = vector.extract_strided_slice %61 {offsets = [0, 32], sizes = [2, 32], strides = [1, 1]} : vector<2x128xf32> to vector<2x32xf32>
    %65 = vector.extract_strided_slice %61 {offsets = [0, 96], sizes = [2, 32], strides = [1, 1]} : vector<2x128xf32> to vector<2x32xf32>
    %66 = vector.extract_strided_slice %62 {offsets = [0, 64], sizes = [2, 32], strides = [1, 1]} : vector<2x128xf32> to vector<2x32xf32>
    %67 = arith.mulf %64, %29 : vector<2x32xf32>
    %68 = arith.mulf %63, %66 : vector<2x32xf32>
    %69 = arith.addf %67, %68 : vector<2x32xf32>
    %70 = math.tanh %69 : vector<2x32xf32>
    %71 = arith.mulf %65, %70 : vector<2x32xf32>
    %72 = tpu.concatenate %71, %52 in 1 : vector<2x32xf32>, vector<2x32xf32> -> vector<2x64xf32>
    %73 = arith.truncf %72 : vector<2x64xf32> to vector<2x64xbf16>
    %cst_14 = arith.constant dense<0.000000e+00> : vector<2x256xf32>
    %74 = tpu.matmul %73, %5, %cst_14 {dimension_numbers = #tpu.dot_dimension_numbers<[1], [0], [0], [1], [0, 0, 1, 1], [], []>} : vector<2x64xbf16>, vector<64x256xbf16>, vector<2x256xf32> -> vector<2x256xf32>
    %75 = vector.extract_strided_slice %74 {offsets = [0, 128], sizes = [2, 128], strides = [1, 1]} : vector<2x256xf32> to vector<2x128xf32>
    %76 = vector.broadcast %2 : vector<1x128xf32> to vector<2x128xf32>
    %77 = arith.addf %75, %76 : vector<2x128xf32>
    %78 = arith.negf %77 : vector<2x128xf32>
    %79 = math.exp %78 : vector<2x128xf32>
    %cst_15 = arith.constant 1.000000e+00 : f32
    %80 = vector.broadcast %cst_15 : f32 to vector<2x128xf32>
    %81 = arith.addf %80, %79 : vector<2x128xf32>
    %82 = arith.divf %80, %81 : vector<2x128xf32>
    %83 = math.tanh %77 : vector<2x128xf32>
    %84 = vector.extract_strided_slice %82 {offsets = [0, 0], sizes = [2, 32], strides = [1, 1]} : vector<2x128xf32> to vector<2x32xf32>
    %85 = vector.extract_strided_slice %82 {offsets = [0, 32], sizes = [2, 32], strides = [1, 1]} : vector<2x128xf32> to vector<2x32xf32>
    %86 = vector.extract_strided_slice %82 {offsets = [0, 96], sizes = [2, 32], strides = [1, 1]} : vector<2x128xf32> to vector<2x32xf32>
    %87 = vector.extract_strided_slice %83 {offsets = [0, 64], sizes = [2, 32], strides = [1, 1]} : vector<2x128xf32> to vector<2x32xf32>
    %88 = arith.mulf %85, %50 : vector<2x32xf32>
    %89 = arith.mulf %84, %87 : vector<2x32xf32>
    %90 = arith.addf %88, %89 : vector<2x32xf32>
    %91 = math.tanh %90 : vector<2x32xf32>
    %92 = arith.mulf %86, %91 : vector<2x32xf32>
    %93 = vector.extract_strided_slice %13 {offsets = [2, 0, 0], sizes = [1, 2, 128], strides = [1, 1, 1]} : vector<8x2x128xf32> to vector<1x2x128xf32>
    %94 = vector.shape_cast %93 : vector<1x2x128xf32> to vector<2x128xf32>
    %95 = vector.extract_strided_slice %74 {offsets = [0, 0], sizes = [2, 128], strides = [1, 1]} : vector<2x256xf32> to vector<2x128xf32>
    %96 = arith.addf %94, %95 : vector<2x128xf32>
    %97 = arith.negf %96 : vector<2x128xf32>
    %98 = math.exp %97 : vector<2x128xf32>
    %cst_16 = arith.constant 1.000000e+00 : f32
    %99 = vector.broadcast %cst_16 : f32 to vector<2x128xf32>
    %100 = arith.addf %99, %98 : vector<2x128xf32>
    %101 = arith.divf %99, %100 : vector<2x128xf32>
    %102 = math.tanh %96 : vector<2x128xf32>
    %103 = vector.extract_strided_slice %101 {offsets = [0, 0], sizes = [2, 32], strides = [1, 1]} : vector<2x128xf32> to vector<2x32xf32>
    %104 = vector.extract_strided_slice %101 {offsets = [0, 32], sizes = [2, 32], strides = [1, 1]} : vector<2x128xf32> to vector<2x32xf32>
    %105 = vector.extract_strided_slice %101 {offsets = [0, 96], sizes = [2, 32], strides = [1, 1]} : vector<2x128xf32> to vector<2x32xf32>
    %106 = vector.extract_strided_slice %102 {offsets = [0, 64], sizes = [2, 32], strides = [1, 1]} : vector<2x128xf32> to vector<2x32xf32>
    %107 = arith.mulf %104, %69 : vector<2x32xf32>
    %108 = arith.mulf %103, %106 : vector<2x32xf32>
    %109 = arith.addf %107, %108 : vector<2x32xf32>
    %110 = math.tanh %109 : vector<2x32xf32>
    %111 = arith.mulf %105, %110 : vector<2x32xf32>
    %112 = tpu.concatenate %111, %92 in 1 : vector<2x32xf32>, vector<2x32xf32> -> vector<2x64xf32>
    %113 = arith.truncf %112 : vector<2x64xf32> to vector<2x64xbf16>
    %cst_17 = arith.constant dense<0.000000e+00> : vector<2x256xf32>
    %114 = tpu.matmul %113, %5, %cst_17 {dimension_numbers = #tpu.dot_dimension_numbers<[1], [0], [0], [1], [0, 0, 1, 1], [], []>} : vector<2x64xbf16>, vector<64x256xbf16>, vector<2x256xf32> -> vector<2x256xf32>
    %115 = vector.extract_strided_slice %114 {offsets = [0, 128], sizes = [2, 128], strides = [1, 1]} : vector<2x256xf32> to vector<2x128xf32>
    %116 = vector.broadcast %2 : vector<1x128xf32> to vector<2x128xf32>
    %117 = arith.addf %115, %116 : vector<2x128xf32>
    %118 = arith.negf %117 : vector<2x128xf32>
    %119 = math.exp %118 : vector<2x128xf32>
    %cst_18 = arith.constant 1.000000e+00 : f32
    %120 = vector.broadcast %cst_18 : f32 to vector<2x128xf32>
    %121 = arith.addf %120, %119 : vector<2x128xf32>
    %122 = arith.divf %120, %121 : vector<2x128xf32>
    %123 = math.tanh %117 : vector<2x128xf32>
    %124 = vector.extract_strided_slice %122 {offsets = [0, 0], sizes = [2, 32], strides = [1, 1]} : vector<2x128xf32> to vector<2x32xf32>
    %125 = vector.extract_strided_slice %122 {offsets = [0, 32], sizes = [2, 32], strides = [1, 1]} : vector<2x128xf32> to vector<2x32xf32>
    %126 = vector.extract_strided_slice %122 {offsets = [0, 96], sizes = [2, 32], strides = [1, 1]} : vector<2x128xf32> to vector<2x32xf32>
    %127 = vector.extract_strided_slice %123 {offsets = [0, 64], sizes = [2, 32], strides = [1, 1]} : vector<2x128xf32> to vector<2x32xf32>
    %128 = arith.mulf %125, %90 : vector<2x32xf32>
    %129 = arith.mulf %124, %127 : vector<2x32xf32>
    %130 = arith.addf %128, %129 : vector<2x32xf32>
    %131 = math.tanh %130 : vector<2x32xf32>
    %132 = arith.mulf %126, %131 : vector<2x32xf32>
    %133 = vector.extract_strided_slice %13 {offsets = [3, 0, 0], sizes = [1, 2, 128], strides = [1, 1, 1]} : vector<8x2x128xf32> to vector<1x2x128xf32>
    %134 = vector.shape_cast %133 : vector<1x2x128xf32> to vector<2x128xf32>
    %135 = vector.extract_strided_slice %114 {offsets = [0, 0], sizes = [2, 128], strides = [1, 1]} : vector<2x256xf32> to vector<2x128xf32>
    %136 = arith.addf %134, %135 : vector<2x128xf32>
    %137 = arith.negf %136 : vector<2x128xf32>
    %138 = math.exp %137 : vector<2x128xf32>
    %cst_19 = arith.constant 1.000000e+00 : f32
    %139 = vector.broadcast %cst_19 : f32 to vector<2x128xf32>
    %140 = arith.addf %139, %138 : vector<2x128xf32>
    %141 = arith.divf %139, %140 : vector<2x128xf32>
    %142 = math.tanh %136 : vector<2x128xf32>
    %143 = vector.extract_strided_slice %141 {offsets = [0, 0], sizes = [2, 32], strides = [1, 1]} : vector<2x128xf32> to vector<2x32xf32>
    %144 = vector.extract_strided_slice %141 {offsets = [0, 32], sizes = [2, 32], strides = [1, 1]} : vector<2x128xf32> to vector<2x32xf32>
    %145 = vector.extract_strided_slice %141 {offsets = [0, 96], sizes = [2, 32], strides = [1, 1]} : vector<2x128xf32> to vector<2x32xf32>
    %146 = vector.extract_strided_slice %142 {offsets = [0, 64], sizes = [2, 32], strides = [1, 1]} : vector<2x128xf32> to vector<2x32xf32>
    %147 = arith.mulf %144, %109 : vector<2x32xf32>
    %148 = arith.mulf %143, %146 : vector<2x32xf32>
    %149 = arith.addf %147, %148 : vector<2x32xf32>
    %150 = math.tanh %149 : vector<2x32xf32>
    %151 = arith.mulf %145, %150 : vector<2x32xf32>
    %152 = tpu.concatenate %151, %132 in 1 : vector<2x32xf32>, vector<2x32xf32> -> vector<2x64xf32>
    %153 = arith.truncf %152 : vector<2x64xf32> to vector<2x64xbf16>
    %cst_20 = arith.constant dense<0.000000e+00> : vector<2x256xf32>
    %154 = tpu.matmul %153, %5, %cst_20 {dimension_numbers = #tpu.dot_dimension_numbers<[1], [0], [0], [1], [0, 0, 1, 1], [], []>} : vector<2x64xbf16>, vector<64x256xbf16>, vector<2x256xf32> -> vector<2x256xf32>
    %155 = vector.extract_strided_slice %154 {offsets = [0, 128], sizes = [2, 128], strides = [1, 1]} : vector<2x256xf32> to vector<2x128xf32>
    %156 = vector.broadcast %2 : vector<1x128xf32> to vector<2x128xf32>
    %157 = arith.addf %155, %156 : vector<2x128xf32>
    %158 = arith.negf %157 : vector<2x128xf32>
    %159 = math.exp %158 : vector<2x128xf32>
    %cst_21 = arith.constant 1.000000e+00 : f32
    %160 = vector.broadcast %cst_21 : f32 to vector<2x128xf32>
    %161 = arith.addf %160, %159 : vector<2x128xf32>
    %162 = arith.divf %160, %161 : vector<2x128xf32>
    %163 = math.tanh %157 : vector<2x128xf32>
    %164 = vector.extract_strided_slice %162 {offsets = [0, 0], sizes = [2, 32], strides = [1, 1]} : vector<2x128xf32> to vector<2x32xf32>
    %165 = vector.extract_strided_slice %162 {offsets = [0, 32], sizes = [2, 32], strides = [1, 1]} : vector<2x128xf32> to vector<2x32xf32>
    %166 = vector.extract_strided_slice %162 {offsets = [0, 96], sizes = [2, 32], strides = [1, 1]} : vector<2x128xf32> to vector<2x32xf32>
    %167 = vector.extract_strided_slice %163 {offsets = [0, 64], sizes = [2, 32], strides = [1, 1]} : vector<2x128xf32> to vector<2x32xf32>
    %168 = arith.mulf %165, %130 : vector<2x32xf32>
    %169 = arith.mulf %164, %167 : vector<2x32xf32>
    %170 = arith.addf %168, %169 : vector<2x32xf32>
    %171 = math.tanh %170 : vector<2x32xf32>
    %172 = arith.mulf %166, %171 : vector<2x32xf32>
    %173 = vector.extract_strided_slice %13 {offsets = [4, 0, 0], sizes = [1, 2, 128], strides = [1, 1, 1]} : vector<8x2x128xf32> to vector<1x2x128xf32>
    %174 = vector.shape_cast %173 : vector<1x2x128xf32> to vector<2x128xf32>
    %175 = vector.extract_strided_slice %154 {offsets = [0, 0], sizes = [2, 128], strides = [1, 1]} : vector<2x256xf32> to vector<2x128xf32>
    %176 = arith.addf %174, %175 : vector<2x128xf32>
    %177 = arith.negf %176 : vector<2x128xf32>
    %178 = math.exp %177 : vector<2x128xf32>
    %cst_22 = arith.constant 1.000000e+00 : f32
    %179 = vector.broadcast %cst_22 : f32 to vector<2x128xf32>
    %180 = arith.addf %179, %178 : vector<2x128xf32>
    %181 = arith.divf %179, %180 : vector<2x128xf32>
    %182 = math.tanh %176 : vector<2x128xf32>
    %183 = vector.extract_strided_slice %181 {offsets = [0, 0], sizes = [2, 32], strides = [1, 1]} : vector<2x128xf32> to vector<2x32xf32>
    %184 = vector.extract_strided_slice %181 {offsets = [0, 32], sizes = [2, 32], strides = [1, 1]} : vector<2x128xf32> to vector<2x32xf32>
    %185 = vector.extract_strided_slice %181 {offsets = [0, 96], sizes = [2, 32], strides = [1, 1]} : vector<2x128xf32> to vector<2x32xf32>
    %186 = vector.extract_strided_slice %182 {offsets = [0, 64], sizes = [2, 32], strides = [1, 1]} : vector<2x128xf32> to vector<2x32xf32>
    %187 = arith.mulf %184, %149 : vector<2x32xf32>
    %188 = arith.mulf %183, %186 : vector<2x32xf32>
    %189 = arith.addf %187, %188 : vector<2x32xf32>
    %190 = math.tanh %189 : vector<2x32xf32>
    %191 = arith.mulf %185, %190 : vector<2x32xf32>
    %192 = tpu.concatenate %191, %172 in 1 : vector<2x32xf32>, vector<2x32xf32> -> vector<2x64xf32>
    %193 = arith.truncf %192 : vector<2x64xf32> to vector<2x64xbf16>
    %cst_23 = arith.constant dense<0.000000e+00> : vector<2x256xf32>
    %194 = tpu.matmul %193, %5, %cst_23 {dimension_numbers = #tpu.dot_dimension_numbers<[1], [0], [0], [1], [0, 0, 1, 1], [], []>} : vector<2x64xbf16>, vector<64x256xbf16>, vector<2x256xf32> -> vector<2x256xf32>
    %195 = vector.extract_strided_slice %194 {offsets = [0, 128], sizes = [2, 128], strides = [1, 1]} : vector<2x256xf32> to vector<2x128xf32>
    %196 = vector.broadcast %2 : vector<1x128xf32> to vector<2x128xf32>
    %197 = arith.addf %195, %196 : vector<2x128xf32>
    %198 = arith.negf %197 : vector<2x128xf32>
    %199 = math.exp %198 : vector<2x128xf32>
    %cst_24 = arith.constant 1.000000e+00 : f32
    %200 = vector.broadcast %cst_24 : f32 to vector<2x128xf32>
    %201 = arith.addf %200, %199 : vector<2x128xf32>
    %202 = arith.divf %200, %201 : vector<2x128xf32>
    %203 = math.tanh %197 : vector<2x128xf32>
    %204 = vector.extract_strided_slice %202 {offsets = [0, 0], sizes = [2, 32], strides = [1, 1]} : vector<2x128xf32> to vector<2x32xf32>
    %205 = vector.extract_strided_slice %202 {offsets = [0, 32], sizes = [2, 32], strides = [1, 1]} : vector<2x128xf32> to vector<2x32xf32>
    %206 = vector.extract_strided_slice %202 {offsets = [0, 96], sizes = [2, 32], strides = [1, 1]} : vector<2x128xf32> to vector<2x32xf32>
    %207 = vector.extract_strided_slice %203 {offsets = [0, 64], sizes = [2, 32], strides = [1, 1]} : vector<2x128xf32> to vector<2x32xf32>
    %208 = arith.mulf %205, %170 : vector<2x32xf32>
    %209 = arith.mulf %204, %207 : vector<2x32xf32>
    %210 = arith.addf %208, %209 : vector<2x32xf32>
    %211 = math.tanh %210 : vector<2x32xf32>
    %212 = arith.mulf %206, %211 : vector<2x32xf32>
    %213 = vector.extract_strided_slice %13 {offsets = [5, 0, 0], sizes = [1, 2, 128], strides = [1, 1, 1]} : vector<8x2x128xf32> to vector<1x2x128xf32>
    %214 = vector.shape_cast %213 : vector<1x2x128xf32> to vector<2x128xf32>
    %215 = vector.extract_strided_slice %194 {offsets = [0, 0], sizes = [2, 128], strides = [1, 1]} : vector<2x256xf32> to vector<2x128xf32>
    %216 = arith.addf %214, %215 : vector<2x128xf32>
    %217 = arith.negf %216 : vector<2x128xf32>
    %218 = math.exp %217 : vector<2x128xf32>
    %cst_25 = arith.constant 1.000000e+00 : f32
    %219 = vector.broadcast %cst_25 : f32 to vector<2x128xf32>
    %220 = arith.addf %219, %218 : vector<2x128xf32>
    %221 = arith.divf %219, %220 : vector<2x128xf32>
    %222 = math.tanh %216 : vector<2x128xf32>
    %223 = vector.extract_strided_slice %221 {offsets = [0, 0], sizes = [2, 32], strides = [1, 1]} : vector<2x128xf32> to vector<2x32xf32>
    %224 = vector.extract_strided_slice %221 {offsets = [0, 32], sizes = [2, 32], strides = [1, 1]} : vector<2x128xf32> to vector<2x32xf32>
    %225 = vector.extract_strided_slice %221 {offsets = [0, 96], sizes = [2, 32], strides = [1, 1]} : vector<2x128xf32> to vector<2x32xf32>
    %226 = vector.extract_strided_slice %222 {offsets = [0, 64], sizes = [2, 32], strides = [1, 1]} : vector<2x128xf32> to vector<2x32xf32>
    %227 = arith.mulf %224, %189 : vector<2x32xf32>
    %228 = arith.mulf %223, %226 : vector<2x32xf32>
    %229 = arith.addf %227, %228 : vector<2x32xf32>
    %230 = math.tanh %229 : vector<2x32xf32>
    %231 = arith.mulf %225, %230 : vector<2x32xf32>
    %232 = tpu.concatenate %231, %212 in 1 : vector<2x32xf32>, vector<2x32xf32> -> vector<2x64xf32>
    %233 = arith.truncf %232 : vector<2x64xf32> to vector<2x64xbf16>
    %cst_26 = arith.constant dense<0.000000e+00> : vector<2x256xf32>
    %234 = tpu.matmul %233, %5, %cst_26 {dimension_numbers = #tpu.dot_dimension_numbers<[1], [0], [0], [1], [0, 0, 1, 1], [], []>} : vector<2x64xbf16>, vector<64x256xbf16>, vector<2x256xf32> -> vector<2x256xf32>
    %235 = vector.extract_strided_slice %234 {offsets = [0, 128], sizes = [2, 128], strides = [1, 1]} : vector<2x256xf32> to vector<2x128xf32>
    %236 = vector.broadcast %2 : vector<1x128xf32> to vector<2x128xf32>
    %237 = arith.addf %235, %236 : vector<2x128xf32>
    %238 = arith.negf %237 : vector<2x128xf32>
    %239 = math.exp %238 : vector<2x128xf32>
    %cst_27 = arith.constant 1.000000e+00 : f32
    %240 = vector.broadcast %cst_27 : f32 to vector<2x128xf32>
    %241 = arith.addf %240, %239 : vector<2x128xf32>
    %242 = arith.divf %240, %241 : vector<2x128xf32>
    %243 = math.tanh %237 : vector<2x128xf32>
    %244 = vector.extract_strided_slice %242 {offsets = [0, 0], sizes = [2, 32], strides = [1, 1]} : vector<2x128xf32> to vector<2x32xf32>
    %245 = vector.extract_strided_slice %242 {offsets = [0, 32], sizes = [2, 32], strides = [1, 1]} : vector<2x128xf32> to vector<2x32xf32>
    %246 = vector.extract_strided_slice %242 {offsets = [0, 96], sizes = [2, 32], strides = [1, 1]} : vector<2x128xf32> to vector<2x32xf32>
    %247 = vector.extract_strided_slice %243 {offsets = [0, 64], sizes = [2, 32], strides = [1, 1]} : vector<2x128xf32> to vector<2x32xf32>
    %248 = arith.mulf %245, %210 : vector<2x32xf32>
    %249 = arith.mulf %244, %247 : vector<2x32xf32>
    %250 = arith.addf %248, %249 : vector<2x32xf32>
    %251 = math.tanh %250 : vector<2x32xf32>
    %252 = arith.mulf %246, %251 : vector<2x32xf32>
    %253 = vector.extract_strided_slice %13 {offsets = [6, 0, 0], sizes = [1, 2, 128], strides = [1, 1, 1]} : vector<8x2x128xf32> to vector<1x2x128xf32>
    %254 = vector.shape_cast %253 : vector<1x2x128xf32> to vector<2x128xf32>
    %255 = vector.extract_strided_slice %234 {offsets = [0, 0], sizes = [2, 128], strides = [1, 1]} : vector<2x256xf32> to vector<2x128xf32>
    %256 = arith.addf %254, %255 : vector<2x128xf32>
    %257 = arith.negf %256 : vector<2x128xf32>
    %258 = math.exp %257 : vector<2x128xf32>
    %cst_28 = arith.constant 1.000000e+00 : f32
    %259 = vector.broadcast %cst_28 : f32 to vector<2x128xf32>
    %260 = arith.addf %259, %258 : vector<2x128xf32>
    %261 = arith.divf %259, %260 : vector<2x128xf32>
    %262 = math.tanh %256 : vector<2x128xf32>
    %263 = vector.extract_strided_slice %261 {offsets = [0, 0], sizes = [2, 32], strides = [1, 1]} : vector<2x128xf32> to vector<2x32xf32>
    %264 = vector.extract_strided_slice %261 {offsets = [0, 32], sizes = [2, 32], strides = [1, 1]} : vector<2x128xf32> to vector<2x32xf32>
    %265 = vector.extract_strided_slice %261 {offsets = [0, 96], sizes = [2, 32], strides = [1, 1]} : vector<2x128xf32> to vector<2x32xf32>
    %266 = vector.extract_strided_slice %262 {offsets = [0, 64], sizes = [2, 32], strides = [1, 1]} : vector<2x128xf32> to vector<2x32xf32>
    %267 = arith.mulf %264, %229 : vector<2x32xf32>
    %268 = arith.mulf %263, %266 : vector<2x32xf32>
    %269 = arith.addf %267, %268 : vector<2x32xf32>
    %270 = math.tanh %269 : vector<2x32xf32>
    %271 = arith.mulf %265, %270 : vector<2x32xf32>
    %272 = tpu.concatenate %271, %252 in 1 : vector<2x32xf32>, vector<2x32xf32> -> vector<2x64xf32>
    %273 = arith.truncf %272 : vector<2x64xf32> to vector<2x64xbf16>
    %cst_29 = arith.constant dense<0.000000e+00> : vector<2x256xf32>
    %274 = tpu.matmul %273, %5, %cst_29 {dimension_numbers = #tpu.dot_dimension_numbers<[1], [0], [0], [1], [0, 0, 1, 1], [], []>} : vector<2x64xbf16>, vector<64x256xbf16>, vector<2x256xf32> -> vector<2x256xf32>
    %275 = vector.extract_strided_slice %274 {offsets = [0, 128], sizes = [2, 128], strides = [1, 1]} : vector<2x256xf32> to vector<2x128xf32>
    %276 = vector.broadcast %2 : vector<1x128xf32> to vector<2x128xf32>
    %277 = arith.addf %275, %276 : vector<2x128xf32>
    %278 = arith.negf %277 : vector<2x128xf32>
    %279 = math.exp %278 : vector<2x128xf32>
    %cst_30 = arith.constant 1.000000e+00 : f32
    %280 = vector.broadcast %cst_30 : f32 to vector<2x128xf32>
    %281 = arith.addf %280, %279 : vector<2x128xf32>
    %282 = arith.divf %280, %281 : vector<2x128xf32>
    %283 = math.tanh %277 : vector<2x128xf32>
    %284 = vector.extract_strided_slice %282 {offsets = [0, 0], sizes = [2, 32], strides = [1, 1]} : vector<2x128xf32> to vector<2x32xf32>
    %285 = vector.extract_strided_slice %282 {offsets = [0, 32], sizes = [2, 32], strides = [1, 1]} : vector<2x128xf32> to vector<2x32xf32>
    %286 = vector.extract_strided_slice %282 {offsets = [0, 96], sizes = [2, 32], strides = [1, 1]} : vector<2x128xf32> to vector<2x32xf32>
    %287 = vector.extract_strided_slice %283 {offsets = [0, 64], sizes = [2, 32], strides = [1, 1]} : vector<2x128xf32> to vector<2x32xf32>
    %288 = arith.mulf %285, %250 : vector<2x32xf32>
    %289 = arith.mulf %284, %287 : vector<2x32xf32>
    %290 = arith.addf %288, %289 : vector<2x32xf32>
    %291 = math.tanh %290 : vector<2x32xf32>
    %292 = arith.mulf %286, %291 : vector<2x32xf32>
    %293 = vector.extract_strided_slice %13 {offsets = [7, 0, 0], sizes = [1, 2, 128], strides = [1, 1, 1]} : vector<8x2x128xf32> to vector<1x2x128xf32>
    %294 = vector.shape_cast %293 : vector<1x2x128xf32> to vector<2x128xf32>
    %295 = vector.extract_strided_slice %274 {offsets = [0, 0], sizes = [2, 128], strides = [1, 1]} : vector<2x256xf32> to vector<2x128xf32>
    %296 = arith.addf %294, %295 : vector<2x128xf32>
    %297 = arith.negf %296 : vector<2x128xf32>
    %298 = math.exp %297 : vector<2x128xf32>
    %cst_31 = arith.constant 1.000000e+00 : f32
    %299 = vector.broadcast %cst_31 : f32 to vector<2x128xf32>
    %300 = arith.addf %299, %298 : vector<2x128xf32>
    %301 = arith.divf %299, %300 : vector<2x128xf32>
    %302 = math.tanh %296 : vector<2x128xf32>
    %303 = vector.extract_strided_slice %301 {offsets = [0, 0], sizes = [2, 32], strides = [1, 1]} : vector<2x128xf32> to vector<2x32xf32>
    %304 = vector.extract_strided_slice %301 {offsets = [0, 32], sizes = [2, 32], strides = [1, 1]} : vector<2x128xf32> to vector<2x32xf32>
    %305 = vector.extract_strided_slice %301 {offsets = [0, 96], sizes = [2, 32], strides = [1, 1]} : vector<2x128xf32> to vector<2x32xf32>
    %306 = vector.extract_strided_slice %302 {offsets = [0, 64], sizes = [2, 32], strides = [1, 1]} : vector<2x128xf32> to vector<2x32xf32>
    %307 = arith.mulf %304, %269 : vector<2x32xf32>
    %308 = arith.mulf %303, %306 : vector<2x32xf32>
    %309 = arith.addf %307, %308 : vector<2x32xf32>
    %310 = math.tanh %309 : vector<2x32xf32>
    %311 = arith.mulf %305, %310 : vector<2x32xf32>
    %312 = tpu.concatenate %311, %292 in 1 : vector<2x32xf32>, vector<2x32xf32> -> vector<2x64xf32>
    %313 = arith.truncf %312 : vector<2x64xf32> to vector<2x64xbf16>
    %cst_32 = arith.constant dense<0.000000e+00> : vector<2x256xf32>
    %314 = tpu.matmul %313, %5, %cst_32 {dimension_numbers = #tpu.dot_dimension_numbers<[1], [0], [0], [1], [0, 0, 1, 1], [], []>} : vector<2x64xbf16>, vector<64x256xbf16>, vector<2x256xf32> -> vector<2x256xf32>
    %315 = vector.extract_strided_slice %314 {offsets = [0, 128], sizes = [2, 128], strides = [1, 1]} : vector<2x256xf32> to vector<2x128xf32>
    %316 = vector.broadcast %2 : vector<1x128xf32> to vector<2x128xf32>
    %317 = arith.addf %315, %316 : vector<2x128xf32>
    %318 = arith.negf %317 : vector<2x128xf32>
    %319 = math.exp %318 : vector<2x128xf32>
    %cst_33 = arith.constant 1.000000e+00 : f32
    %320 = vector.broadcast %cst_33 : f32 to vector<2x128xf32>
    %321 = arith.addf %320, %319 : vector<2x128xf32>
    %322 = arith.divf %320, %321 : vector<2x128xf32>
    %323 = math.tanh %317 : vector<2x128xf32>
    %324 = vector.extract_strided_slice %322 {offsets = [0, 0], sizes = [2, 32], strides = [1, 1]} : vector<2x128xf32> to vector<2x32xf32>
    %325 = vector.extract_strided_slice %322 {offsets = [0, 32], sizes = [2, 32], strides = [1, 1]} : vector<2x128xf32> to vector<2x32xf32>
    %326 = vector.extract_strided_slice %322 {offsets = [0, 96], sizes = [2, 32], strides = [1, 1]} : vector<2x128xf32> to vector<2x32xf32>
    %327 = vector.extract_strided_slice %323 {offsets = [0, 64], sizes = [2, 32], strides = [1, 1]} : vector<2x128xf32> to vector<2x32xf32>
    %328 = arith.mulf %325, %290 : vector<2x32xf32>
    %329 = arith.mulf %324, %327 : vector<2x32xf32>
    %330 = arith.addf %328, %329 : vector<2x32xf32>
    %331 = math.tanh %330 : vector<2x32xf32>
    %332 = arith.mulf %326, %331 : vector<2x32xf32>
    %333 = vector.broadcast %3 : vector<1x32xf32> to vector<2x32xf32>
    %334 = arith.mulf %332, %333 : vector<2x32xf32>
    %cst_34 = arith.constant dense<0.000000e+00> : vector<2xf32>
    %335 = vector.multi_reduction <add>, %334, %cst_34 [1] : vector<2x32xf32> to vector<2xf32>
    %336 = vector.shape_cast %335 : vector<2xf32> to vector<2x1xf32>
    %337 = vector.broadcast %4 : vector<1x1xf32> to vector<2x1xf32>
    %338 = arith.addf %336, %337 : vector<2x1xf32>
    %c0_35 = arith.constant 0 : index
    %c0_36 = arith.constant 0 : index
    %339 = vector.load %arg3[%c0_35, %c0_36] : memref<2x1xf32, #tpu.memory_space<vmem>>, vector<2x1xf32>
    tpu.vector_store %arg3[%c0_35, %c0_36], %338 {strides = array<i32>} : memref<2x1xf32, #tpu.memory_space<vmem>>, vector<2x1xf32>,
    return
  }
}

</mosaic_0001>

<bundles_post_ra>
// kernel: tpu_custom_call.1
= control target key start
LH: loop header
LB: loop body
LE: loop exit
PB: predicated region body
PF: predicated region fallthrough
CT: control target
= control target key end

     0   :  { %8 = vsyncpa [#allocation3], 0  ;;  %s1225_s12 = smov [#allocation2]   ;;  %s1550_s0 = inlined_call_operand.vmem [shape: f32[8,2,1], index: 0, kind: input, shape index: {}]   ;;  %s1551_s1 = inlined_call_operand.hbm [shape: bf16[64,256], index: 1, kind: input, shape index: {}]   ;;  %s1552_s2 = inlined_call_operand.vmem [shape: f32[8,128], index: 2, kind: input, shape index: {}]   ;;  %s1553_s3 = inlined_call_operand.vmem [shape: f32[2,1], index: 3, kind: output, shape index: {}]  }
   0x1   :  { %s16_s13 = sshll.u32 %s1225_s12, 4  ;;  %s1201_s16 = scalar_lea.hbm %s1551_s1, 1024  ;;  %s17_s13 = int_to_ptr.vmem [resolvable:$true] %s16_s13 }
   0x2   :  { %p1202_p0 = scmp.ne.s32.totalorder %s1551_s1, %s1201_s16  ;;  %p1205_p1 = scmp.lt.u32.totalorder %s1201_s16, %s1551_s1 }
   0x4   :  { %p1207_p2 = pnand %p1205_p1, %p1202_p0 }
   0x6   :  { %1210 = shalt.err (!%p1207_p2)
}
   0x7   :  { %s1211_s21 = scalar_lea.vmem %s17_s13, 1024  ;;  %p1216_p4 = scmp.lt.s32.totalorder %s17_s13, %s17_s13 }
   0x8   :  { %p1212_p3 = scmp.ne.s32.totalorder %s17_s13, %s1211_s21  ;;  %p1217_p5 = scmp.lt.s32.totalorder %s1211_s21, %s1211_s21 }
   0xa   :  { %p1218_p6 = por %p1217_p5, %p1216_p4 }
   0xc   :  { %p1219_p7 = pnand %p1218_p6, %p1212_p3 }
   0xe   :  { %1222 = shalt.err (!%p1219_p7)
}
   0xf   :  { %s1226_s22 = smov 128   ;;  %s1227_s23 = smov 8  }
  0x10   :  { %22 = dma.hbm_to_vmem [thread:$0]  %s1551_s1, 1024, %s17_s13, [#allocation3], %s1226_s22, %s1226_s22, %s1227_s23  }
  0x11   :  { %1223 = dma.done.wait [#allocation3], 1024  }
  0x12   :  { %1224 = vsyncadd [#allocation3], 4294966272  ;;  %v1228_v0 = vmov 0   ;;  %v42_v1 = vld [vmem:[%s1550_s0] sm:$0x3]  ;;  %s1229_s4 = smov 64  }
  0x13   :  { %1059 = vset.pattern.permute.xlu0 %v1228_v0  ;;  %221 = vmatprep.mubr.bf16.mxu0 %v1228_v0  ;;  %v1274_v2 = vld [vmem:[%s1552_s2] ss:$0 sm:$0xff]  ;;  %v1279_v4 = vld [vmem:[%s1552_s2 + $0x1] ss:$0 sm:$0xff]  ;;  %s1230_s5 = smov 32   ;;  %vm142_vm0 = vcmask 261120  }
  0x14   :  { %1060 = vset.pattern.permute.xlu1 %v1228_v0  ;;  %329 = vmatprep.mubr.bf16.mxu1 %v1228_v0  ;;  %v1288_v17 = vld [vmem:[#allocation2 + $0x4] ss:$8 sps:$4 sm:$0xff]   ;;  %v1290_v18 = vld [vmem:[#allocation2] ss:$8 sps:$4 sm:$0xff]   ;;  %v1292_v19 = vld [vmem:[#allocation2 + $0x14] ss:$8 sps:$4 sm:$0xff]  }
  0x15   :  { %52 = vperm.xlu0 %1059, %v42_v1   ;;  %189 = vmatprep.subr.bf16.mxu0 %v1288_v17  ;;  %v1297_v20 = vld [vmem:[#allocation2 + $0x10] ss:$8 sps:$4 sm:$0xff]   ;;  %v1301_v21 = vld [vmem:[#allocation2 + $0x24] ss:$8 sps:$4 sm:$0xff]   ;;  %v1305_v22 = vld [vmem:[#allocation2 + $0x20] ss:$8 sps:$4 sm:$0xff]  }
  0x16   :  { %297 = vmatprep.subr.bf16.mxu1 %v1288_v17  ;;  %190 = vmatpush1.bf16.msra.mxu0 %v1290_v18  ;;  %v1309_v23 = vld [vmem:[#allocation2 + $0x34] ss:$8 sps:$4 sm:$0xff]   ;;  %v1317_v25 = vld [vmem:[#allocation2 + $0x30] ss:$8 sps:$4 sm:$0xff]   ;;  %v43_v26 = vld [vmem:[%s1550_s0 + $0x2] sm:$0x3] }
  0x17   :  { %298 = vmatpush1.bf16.msra.mxu1 %v1290_v18  ;;  %191 = vmatprep.subr.bf16.mxu0 %v1292_v19  ;;  %vm185_vm1 = vcmask 523264   ;;  %v1343_v35 = vld [vmem:[%s1552_s2 + $0x2] ss:$0 sm:$0xff]  ;;  %s1231_s23 = smov 96   ;;  %vm999_vm2 = vcmask 254976   ;;  %vm1008_vm3 = vcmask 1024  }
  0x18   :  { %299 = vmatprep.subr.bf16.mxu1 %v1292_v19 }
  0x1a   :  { %192 = vmatpush1.bf16.msra.mxu0 %v1297_v20 }
  0x1b   :  { %300 = vmatpush1.bf16.msra.mxu1 %v1297_v20  ;;  %193 = vmatprep.subr.bf16.mxu0 %v1301_v21 }
  0x1c   :  { %301 = vmatprep.subr.bf16.mxu1 %v1301_v21 }
  0x1e   :  { %194 = vmatpush1.bf16.msra.mxu0 %v1305_v22 }
  0x1f   :  { %195 = vmatprep.subr.bf16.mxu0 %v1309_v23  ;;  %302 = vmatpush1.bf16.msra.mxu1 %v1305_v22 }
  0x20   :  { %303 = vmatprep.subr.bf16.mxu1 %v1309_v23 }
  0x22   :  { %196 = vmatpush1.bf16.msra.mxu0 %v1317_v25 }
  0x23   :  { %304 = vmatpush1.bf16.msra.mxu1 %v1317_v25  ;;  %401 = vmatprep.subr.bf16.mxu0 %v1288_v17 }
  0x24   :  { %505 = vmatprep.subr.bf16.mxu1 %v1288_v17 }
  0x94   :  { %v53_v3 = vpop.permute.xlu0 %52 }
  0x95   :  { %v94_v5 = vmul.f32 %v1274_v2, %v53_v3 }
  0x97   :  { %v106_v6 = vadd.f32 %v1279_v4, %v94_v5 }
  0x99   :  { %1073 = vtanh.f32 %v106_v6  ;;  %v1017_v8 = vmul.f32 -1.442695, %v106_v6 }
  0x9b   :  { %1075 = vpow2.f32 %v1017_v8 }
  0xa3   :  { %v1074_v7 = vpop.eup %1073 }
  0xa4   :  { %123 = vrot.lane.b32.xlu0 %v1074_v7, %s1229_s4  ;;  %v44_v7 = vld [vmem:[%s1550_s0 + $0x4] sm:$0x3] }
  0xa5   :  { %v1076_v9 = vpop.eup %1075 }
  0xa6   :  { %v117_v10 = vadd.f32 1.0, %v1076_v9 }
  0xa8   :  { %1077 = vrcp.f32 %v117_v10 }
  0xb2   :  { %v1078_v11 = vpop.eup %1077 }
  0xb3   :  { %v121_v14 = vmul.f32 0.0, %v1078_v11 }
 0x116   :  { %v124_v12 = vpop.permute.xlu0 %123 }
 0x117   :  { %v126_v13 = vmul.f32 %v1078_v11, %v124_v12 }
 0x119   :  { %128 = vrot.lane.b32.xlu1 %v126_v13, %s1230_s5 }
 0x18b   :  { %v129_v15 = vpop.permute.xlu1 %128 }
 0x18c   :  { %v1285_v16 = vadd.f32 %v129_v15, %v121_v14 }
 0x18e   :  { %1079 = vtanh.f32 %v1285_v16 }
 0x198   :  { %v1080_v24 = vpop.eup %1079 }
 0x199   :  { %134 = vrot.lane.b32.xlu1 %v1080_v24, %s1229_s4 }
 0x19d   :  { %57 = vperm.xlu1 %1060, %v43_v26  }
 0x20b   :  { %v135_v27 = vpop.permute.xlu1 %134 }
 0x20c   :  { %v137_v28 = vmul.f32 %v1078_v11, %v135_v27 }
 0x20e   :  { %139 = vrot.lane.b32.xlu0 %v137_v28, %s1230_s5 }
 0x21c   :  { %v58_v32 = vpop.permute.xlu1 %57 }
 0x21d   :  { %v95_v33 = vmul.f32 %v1274_v2, %v58_v32 }
 0x21f   :  { %v107_v34 = vadd.f32 %v1279_v4, %v95_v33 }
 0x280   :  { %v140_v29 = vpop.permute.xlu0 %139 }
 0x281   :  { %v143_v30 = vsel %vm142_vm0, %v140_v29, 0.0 }
 0x282   :  { %v144_v31 = vpack.c.bf16 %v143_v30, %v143_v30 }
 0x284   :  { %1026 = vmatmul.mubr.msk.bf16.vlgmr.msra.gmra.mrb[0].mxu0 %vm185_vm1, %v144_v31 }
 0x285   :  { %402 = vmatpush1.bf16.msra.mxu0 %v1290_v18  ;;  %433 = vmatprep.mubr.bf16.mxu0 %v1228_v0 }
 0x286   :  { %403 = vmatprep.subr.bf16.mxu0 %v1292_v19 }
 0x289   :  { %404 = vmatpush1.bf16.msra.mxu0 %v1297_v20 }
 0x28a   :  { %405 = vmatprep.subr.bf16.mxu0 %v1301_v21 }
 0x28d   :  { %406 = vmatpush1.bf16.msra.mxu0 %v1305_v22 }
 0x28e   :  { %407 = vmatprep.subr.bf16.mxu0 %v1309_v23 }
 0x291   :  { %408 = vmatpush1.bf16.msra.mxu0 %v1317_v25 }
 0x292   :  { %609 = vmatprep.subr.bf16.mxu0 %v1288_v17 }
 0x357   :  { %v223_v36 = vpop.f32.mrb[0].mxu0 }
 0x358   :  { %v259_v37 = vadd.f32 %v223_v36, %v107_v34  ;;  %v225_v38 = vpop.f32.mrb[1].mxu0 }
 0x359   :  { %v234_v39 = vadd.f32 %v1343_v35, %v225_v38  ;;  %v227_v40 = vpop.f32.mrb[2].mxu0 }
 0x35a   :  { %1081 = vtanh.f32 %v259_v37  ;;  %v228_v41 = vpop.f32.mrb[3].mxu0  ;;  %v1029_v44 = vmul.f32 -1.442695, %v259_v37 }
 0x35b   :  { %1083 = vtanh.f32 %v234_v39  ;;  %v1028_v45 = vmul.f32 -1.442695, %v234_v39 }
 0x35c   :  { %1085 = vpow2.f32 %v1029_v44 }
 0x35d   :  { %1087 = vpow2.f32 %v1028_v45 }
 0x364   :  { %v1082_v42 = vpop.eup %1081 }
 0x365   :  { %v1084_v43 = vpop.eup %1083  ;;  %269 = vrot.lane.b32.xlu1 %v1082_v42, %s1229_s4 }
 0x366   :  { %244 = vrot.lane.b32.xlu0 %v1084_v43, %s1229_s4  ;;  %v1086_v46 = vpop.eup %1085 }
 0x367   :  { %v1088_v47 = vpop.eup %1087  ;;  %v263_v48 = vadd.f32 1.0, %v1086_v46 }
 0x368   :  { %v238_v49 = vadd.f32 1.0, %v1088_v47 }
 0x369   :  { %1089 = vrcp.f32 %v263_v48 }
 0x36a   :  { %1091 = vrcp.f32 %v238_v49 }
 0x373   :  { %v1090_v50 = vpop.eup %1089 }
 0x374   :  { %v1092_v52 = vpop.eup %1091  ;;  %v267_v56 = vmul.f32 %v1090_v50, %v1285_v16 }
 0x375   :  { %v242_v58 = vmul.f32 0.0, %v1092_v52 }
 0x3d7   :  { %v270_v51 = vpop.permute.xlu1 %269 }
 0x3d8   :  { %v272_v53 = vmul.f32 %v1090_v50, %v270_v51  ;;  %v245_v54 = vpop.permute.xlu0 %244 }
 0x3d9   :  { %v247_v55 = vmul.f32 %v1092_v52, %v245_v54 }
 0x3da   :  { %274 = vrot.lane.b32.xlu1 %v272_v53, %s1230_s5 }
 0x3db   :  { %249 = vrot.lane.b32.xlu0 %v247_v55, %s1230_s5 }
 0x44c   :  { %v275_v57 = vpop.permute.xlu1 %274 }
 0x44d   :  { %v1351_v59 = vadd.f32 %v275_v57, %v267_v56  ;;  %v250_v60 = vpop.permute.xlu0 %249  ;;  %v45_v56 = vld [vmem:[%s1550_s0 + $0x6] sm:$0x3] }
 0x44e   :  { %v1353_v61 = vadd.f32 %v250_v60, %v242_v58 }
 0x44f   :  { %1093 = vtanh.f32 %v1351_v59 }
 0x450   :  { %1095 = vtanh.f32 %v1353_v61 }
 0x459   :  { %v1094_v62 = vpop.eup %1093 }
 0x45a   :  { %v1096_v63 = vpop.eup %1095  ;;  %280 = vrot.lane.b32.xlu1 %v1094_v62, %s1229_s4 }
 0x45b   :  { %255 = vrot.lane.b32.xlu0 %v1096_v63, %s1229_s4 }
 0x4cc   :  { %v281_v1 = vpop.permute.xlu1 %280 }
 0x4cd   :  { %v283_v3 = vmul.f32 %v1090_v50, %v281_v1  ;;  %v256_v5 = vpop.permute.xlu0 %255 }
 0x4ce   :  { %v258_v6 = vmul.f32 %v1092_v52, %v256_v5 }
 0x4cf   :  { %285 = vrot.lane.b32.xlu0 %v283_v3, %s1230_s5 }
 0x4d0   :  { %289 = vrot.lane.b32.xlu1 %v258_v6, %s1229_s4 }
 0x4d3   :  { %62 = vperm.xlu0 %1059, %v44_v7  }
 0x541   :  { %v286_v8 = vpop.permute.xlu0 %285 }
 0x542   :  { %v290_v9 = vpop.permute.xlu1 %289 }
 0x543   :  { %v292_v10 = vsel %vm142_vm0, %v286_v8, %v290_v9 }
 0x544   :  { %v293_v11 = vpack.c.bf16 %v292_v10, %v292_v10 }
 0x546   :  { %1030 = vmatmul.mubr.msk.bf16.vlgmr.msra.gmra.mrb[0].mxu1 %vm185_vm1, %v293_v11 }
 0x547   :  { %506 = vmatpush1.bf16.msra.mxu1 %v1290_v18  ;;  %537 = vmatprep.mubr.bf16.mxu1 %v1228_v0 }
 0x548   :  { %507 = vmatprep.subr.bf16.mxu1 %v1292_v19 }
 0x54b   :  { %508 = vmatpush1.bf16.msra.mxu1 %v1297_v20 }
 0x54c   :  { %509 = vmatprep.subr.bf16.mxu1 %v1301_v21 }
 0x54f   :  { %510 = vmatpush1.bf16.msra.mxu1 %v1305_v22 }
 0x550   :  { %511 = vmatprep.subr.bf16.mxu1 %v1309_v23 }
 0x552   :  { %v63_v12 = vpop.permute.xlu0 %62 }
 0x553   :  { %512 = vmatpush1.bf16.msra.mxu1 %v1317_v25  ;;  %v96_v13 = vmul.f32 %v1274_v2, %v63_v12 }
 0x554   :  { %713 = vmatprep.subr.bf16.mxu1 %v1288_v17 }
 0x555   :  { %v108_v14 = vadd.f32 %v1279_v4, %v96_v13 }
 0x619   :  { %v331_v15 = vpop.f32.mrb[0].mxu1 }
 0x61a   :  { %v363_v16 = vadd.f32 %v331_v15, %v108_v14  ;;  %v333_v24 = vpop.f32.mrb[1].mxu1 }
 0x61b   :  { %v338_v26 = vadd.f32 %v1343_v35, %v333_v24  ;;  %v335_v27 = vpop.f32.mrb[2].mxu1 }
 0x61c   :  { %1097 = vtanh.f32 %v363_v16  ;;  %v336_v28 = vpop.f32.mrb[3].mxu1  ;;  %v1032_v31 = vmul.f32 -1.442695, %v363_v16 }
 0x61d   :  { %1099 = vtanh.f32 %v338_v26  ;;  %v1031_v32 = vmul.f32 -1.442695, %v338_v26 }
 0x61e   :  { %1101 = vpow2.f32 %v1032_v31 }
 0x61f   :  { %1103 = vpow2.f32 %v1031_v32 }
 0x626   :  { %v1098_v29 = vpop.eup %1097 }
 0x627   :  { %v1100_v30 = vpop.eup %1099  ;;  %373 = vrot.lane.b32.xlu0 %v1098_v29, %s1229_s4 }
 0x628   :  { %348 = vrot.lane.b32.xlu1 %v1100_v30, %s1229_s4  ;;  %v1102_v33 = vpop.eup %1101 }
 0x629   :  { %v1104_v34 = vpop.eup %1103  ;;  %v367_v36 = vadd.f32 1.0, %v1102_v33 }
 0x62a   :  { %v342_v37 = vadd.f32 1.0, %v1104_v34 }
 0x62b   :  { %1105 = vrcp.f32 %v367_v36 }
 0x62c   :  { %1107 = vrcp.f32 %v342_v37 }
 0x635   :  { %v1106_v38 = vpop.eup %1105 }
 0x636   :  { %v1108_v40 = vpop.eup %1107  ;;  %v371_v44 = vmul.f32 %v1106_v38, %v1351_v59 }
 0x637   :  { %v346_v46 = vmul.f32 %v1108_v40, %v1353_v61 }
 0x699   :  { %v374_v39 = vpop.permute.xlu0 %373 }
 0x69a   :  { %v376_v41 = vmul.f32 %v1106_v38, %v374_v39  ;;  %v349_v42 = vpop.permute.xlu1 %348 }
 0x69b   :  { %v351_v43 = vmul.f32 %v1108_v40, %v349_v42 }
 0x69c   :  { %378 = vrot.lane.b32.xlu0 %v376_v41, %s1230_s5 }
 0x69d   :  { %353 = vrot.lane.b32.xlu1 %v351_v43, %s1230_s5 }
 0x70e   :  { %v379_v45 = vpop.permute.xlu0 %378 }
 0x70f   :  { %v1384_v47 = vadd.f32 %v379_v45, %v371_v44  ;;  %v354_v48 = vpop.permute.xlu1 %353  ;;  %v46_v44 = vld [vmem:[%s1550_s0 + $0x8] sm:$0x3] }
 0x710   :  { %v1386_v49 = vadd.f32 %v354_v48, %v346_v46 }
 0x711   :  { %1109 = vtanh.f32 %v1384_v47 }
 0x712   :  { %1111 = vtanh.f32 %v1386_v49 }
 0x71b   :  { %v1110_v50 = vpop.eup %1109 }
 0x71c   :  { %v1112_v51 = vpop.eup %1111  ;;  %384 = vrot.lane.b32.xlu0 %v1110_v50, %s1229_s4 }
 0x71d   :  { %359 = vrot.lane.b32.xlu1 %v1112_v51, %s1229_s4 }
 0x78e   :  { %v385_v52 = vpop.permute.xlu0 %384 }
 0x78f   :  { %v387_v53 = vmul.f32 %v1106_v38, %v385_v52  ;;  %v360_v54 = vpop.permute.xlu1 %359 }
 0x790   :  { %v362_v55 = vmul.f32 %v1108_v40, %v360_v54 }
 0x791   :  { %389 = vrot.lane.b32.xlu1 %v387_v53, %s1230_s5 }
 0x792   :  { %393 = vrot.lane.b32.xlu0 %v362_v55, %s1229_s4 }
 0x795   :  { %67 = vperm.xlu1 %1060, %v45_v56  }
 0x803   :  { %v390_v57 = vpop.permute.xlu1 %389 }
 0x804   :  { %v394_v58 = vpop.permute.xlu0 %393 }
 0x805   :  { %v396_v59 = vsel %vm142_vm0, %v390_v57, %v394_v58 }
 0x806   :  { %v397_v60 = vpack.c.bf16 %v396_v59, %v396_v59 }
 0x808   :  { %1033 = vmatmul.mubr.msk.bf16.vlgmr.msra.gmra.mrb[4].mxu0 %vm185_vm1, %v397_v60 }
 0x809   :  { %610 = vmatpush1.bf16.msra.mxu0 %v1290_v18  ;;  %641 = vmatprep.mubr.bf16.mxu0 %v1228_v0 }
 0x80a   :  { %611 = vmatprep.subr.bf16.mxu0 %v1292_v19 }
 0x80d   :  { %612 = vmatpush1.bf16.msra.mxu0 %v1297_v20 }
 0x80e   :  { %613 = vmatprep.subr.bf16.mxu0 %v1301_v21 }
 0x811   :  { %614 = vmatpush1.bf16.msra.mxu0 %v1305_v22 }
 0x812   :  { %615 = vmatprep.subr.bf16.mxu0 %v1309_v23 }
 0x814   :  { %v68_v61 = vpop.permute.xlu1 %67 }
 0x815   :  { %616 = vmatpush1.bf16.msra.mxu0 %v1317_v25  ;;  %v97_v62 = vmul.f32 %v1274_v2, %v68_v61 }
 0x816   :  { %817 = vmatprep.subr.bf16.mxu0 %v1288_v17 }
 0x817   :  { %v109_v63 = vadd.f32 %v1279_v4, %v97_v62 }
 0x8db   :  { %v435_v1 = vpop.f32.mrb[4].mxu0 }
 0x8dc   :  { %v467_v3 = vadd.f32 %v435_v1, %v109_v63  ;;  %v437_v5 = vpop.f32.mrb[5].mxu0 }
 0x8dd   :  { %v442_v6 = vadd.f32 %v1343_v35, %v437_v5  ;;  %v439_v7 = vpop.f32.mrb[6].mxu0 }
 0x8de   :  { %1113 = vtanh.f32 %v467_v3  ;;  %v440_v8 = vpop.f32.mrb[7].mxu0  ;;  %v1035_v11 = vmul.f32 -1.442695, %v467_v3 }
 0x8df   :  { %1115 = vtanh.f32 %v442_v6  ;;  %v1034_v12 = vmul.f32 -1.442695, %v442_v6 }
 0x8e0   :  { %1117 = vpow2.f32 %v1035_v11 }
 0x8e1   :  { %1119 = vpow2.f32 %v1034_v12 }
 0x8e8   :  { %v1114_v9 = vpop.eup %1113 }
 0x8e9   :  { %v1116_v10 = vpop.eup %1115  ;;  %477 = vrot.lane.b32.xlu1 %v1114_v9, %s1229_s4 }
 0x8ea   :  { %452 = vrot.lane.b32.xlu0 %v1116_v10, %s1229_s4  ;;  %v1118_v13 = vpop.eup %1117 }
 0x8eb   :  { %v1120_v14 = vpop.eup %1119  ;;  %v471_v15 = vadd.f32 1.0, %v1118_v13 }
 0x8ec   :  { %v446_v16 = vadd.f32 1.0, %v1120_v14 }
 0x8ed   :  { %1121 = vrcp.f32 %v471_v15 }
 0x8ee   :  { %1123 = vrcp.f32 %v446_v16 }
 0x8f7   :  { %v1122_v24 = vpop.eup %1121 }
 0x8f8   :  { %v1124_v27 = vpop.eup %1123  ;;  %v475_v31 = vmul.f32 %v1122_v24, %v1384_v47 }
 0x8f9   :  { %v450_v33 = vmul.f32 %v1124_v27, %v1386_v49 }
 0x95b   :  { %v478_v26 = vpop.permute.xlu1 %477 }
 0x95c   :  { %v480_v28 = vmul.f32 %v1122_v24, %v478_v26  ;;  %v453_v29 = vpop.permute.xlu0 %452 }
 0x95d   :  { %v455_v30 = vmul.f32 %v1124_v27, %v453_v29 }
 0x95e   :  { %482 = vrot.lane.b32.xlu1 %v480_v28, %s1230_s5 }
 0x95f   :  { %457 = vrot.lane.b32.xlu0 %v455_v30, %s1230_s5  ;;  %v47_v30 = vld [vmem:[%s1550_s0 + $0xa] sm:$0x3] }
 0x9d0   :  { %v483_v32 = vpop.permute.xlu1 %482 }
 0x9d1   :  { %v1417_v34 = vadd.f32 %v483_v32, %v475_v31  ;;  %v458_v36 = vpop.permute.xlu0 %457 }
 0x9d2   :  { %v1419_v37 = vadd.f32 %v458_v36, %v450_v33 }
 0x9d3   :  { %1125 = vtanh.f32 %v1417_v34 }
 0x9d4   :  { %1127 = vtanh.f32 %v1419_v37 }
 0x9dd   :  { %v1126_v38 = vpop.eup %1125 }
 0x9de   :  { %v1128_v39 = vpop.eup %1127  ;;  %488 = vrot.lane.b32.xlu1 %v1126_v38, %s1229_s4 }
 0x9df   :  { %463 = vrot.lane.b32.xlu0 %v1128_v39, %s1229_s4 }
 0xa50   :  { %v489_v40 = vpop.permute.xlu1 %488 }
 0xa51   :  { %v491_v41 = vmul.f32 %v1122_v24, %v489_v40  ;;  %v464_v42 = vpop.permute.xlu0 %463 }
 0xa52   :  { %v466_v43 = vmul.f32 %v1124_v27, %v464_v42 }
 0xa53   :  { %493 = vrot.lane.b32.xlu0 %v491_v41, %s1230_s5 }
 0xa54   :  { %497 = vrot.lane.b32.xlu1 %v466_v43, %s1229_s4 }
 0xa57   :  { %72 = vperm.xlu0 %1059, %v46_v44  }
 0xac5   :  { %v494_v45 = vpop.permute.xlu0 %493 }
 0xac6   :  { %v498_v46 = vpop.permute.xlu1 %497 }
 0xac7   :  { %v500_v47 = vsel %vm142_vm0, %v494_v45, %v498_v46 }
 0xac8   :  { %v501_v48 = vpack.c.bf16 %v500_v47, %v500_v47 }
 0xaca   :  { %1036 = vmatmul.mubr.msk.bf16.vlgmr.msra.gmra.mrb[4].mxu1 %vm185_vm1, %v501_v48 }
 0xacb   :  { %714 = vmatpush1.bf16.msra.mxu1 %v1290_v18  ;;  %745 = vmatprep.mubr.bf16.mxu1 %v1228_v0 }
 0xacc   :  { %715 = vmatprep.subr.bf16.mxu1 %v1292_v19 }
 0xacf   :  { %716 = vmatpush1.bf16.msra.mxu1 %v1297_v20 }
 0xad0   :  { %717 = vmatprep.subr.bf16.mxu1 %v1301_v21 }
 0xad3   :  { %718 = vmatpush1.bf16.msra.mxu1 %v1305_v22 }
 0xad4   :  { %719 = vmatprep.subr.bf16.mxu1 %v1309_v23 }
 0xad6   :  { %v73_v49 = vpop.permute.xlu0 %72 }
 0xad7   :  { %720 = vmatpush1.bf16.msra.mxu1 %v1317_v25  ;;  %v98_v50 = vmul.f32 %v1274_v2, %v73_v49 }
 0xad8   :  { %921 = vmatprep.subr.bf16.mxu1 %v1288_v17 }
 0xad9   :  { %v110_v51 = vadd.f32 %v1279_v4, %v98_v50 }
 0xb9d   :  { %v539_v52 = vpop.f32.mrb[4].mxu1 }
 0xb9e   :  { %v571_v53 = vadd.f32 %v539_v52, %v110_v51  ;;  %v541_v54 = vpop.f32.mrb[5].mxu1 }
 0xb9f   :  { %v546_v55 = vadd.f32 %v1343_v35, %v541_v54  ;;  %v543_v56 = vpop.f32.mrb[6].mxu1 }
 0xba0   :  { %1129 = vtanh.f32 %v571_v53  ;;  %v544_v57 = vpop.f32.mrb[7].mxu1  ;;  %v1038_v17 = vmul.f32 -1.442695, %v571_v53 }
 0xba1   :  { %1131 = vtanh.f32 %v546_v55  ;;  %v1037_v60 = vmul.f32 -1.442695, %v546_v55 }
 0xba2   :  { %1133 = vpow2.f32 %v1038_v17 }
 0xba3   :  { %1135 = vpow2.f32 %v1037_v60 }
 0xbaa   :  { %v1130_v58 = vpop.eup %1129 }
 0xbab   :  { %v1132_v59 = vpop.eup %1131  ;;  %581 = vrot.lane.b32.xlu0 %v1130_v58, %s1229_s4 }
 0xbac   :  { %556 = vrot.lane.b32.xlu1 %v1132_v59, %s1229_s4  ;;  %v1134_v61 = vpop.eup %1133 }
 0xbad   :  { %v1136_v62 = vpop.eup %1135  ;;  %v575_v63 = vadd.f32 1.0, %v1134_v61 }
 0xbae   :  { %v550_v1 = vadd.f32 1.0, %v1136_v62 }
 0xbaf   :  { %1137 = vrcp.f32 %v575_v63 }
 0xbb0   :  { %1139 = vrcp.f32 %v550_v1 }
 0xbb9   :  { %v1138_v3 = vpop.eup %1137 }
 0xbba   :  { %v1140_v6 = vpop.eup %1139  ;;  %v579_v10 = vmul.f32 %v1138_v3, %v1417_v34 }
 0xbbb   :  { %v554_v12 = vmul.f32 %v1140_v6, %v1419_v37 }
 0xc1d   :  { %v582_v5 = vpop.permute.xlu0 %581 }
 0xc1e   :  { %v584_v7 = vmul.f32 %v1138_v3, %v582_v5  ;;  %v557_v8 = vpop.permute.xlu1 %556 }
 0xc1f   :  { %v559_v9 = vmul.f32 %v1140_v6, %v557_v8 }
 0xc20   :  { %586 = vrot.lane.b32.xlu0 %v584_v7, %s1230_s5 }
 0xc21   :  { %561 = vrot.lane.b32.xlu1 %v559_v9, %s1230_s5  ;;  %v48_v9 = vld [vmem:[%s1550_s0 + $0xc] sm:$0x3] }
 0xc92   :  { %v587_v11 = vpop.permute.xlu0 %586 }
 0xc93   :  { %v1450_v13 = vadd.f32 %v587_v11, %v579_v10  ;;  %v562_v14 = vpop.permute.xlu1 %561 }
 0xc94   :  { %v1452_v15 = vadd.f32 %v562_v14, %v554_v12 }
 0xc95   :  { %1141 = vtanh.f32 %v1450_v13 }
 0xc96   :  { %1143 = vtanh.f32 %v1452_v15 }
 0xc9f   :  { %v1142_v16 = vpop.eup %1141 }
 0xca0   :  { %v1144_v24 = vpop.eup %1143  ;;  %592 = vrot.lane.b32.xlu0 %v1142_v16, %s1229_s4 }
 0xca1   :  { %567 = vrot.lane.b32.xlu1 %v1144_v24, %s1229_s4 }
 0xd12   :  { %v593_v26 = vpop.permute.xlu0 %592 }
 0xd13   :  { %v595_v27 = vmul.f32 %v1138_v3, %v593_v26  ;;  %v568_v28 = vpop.permute.xlu1 %567 }
 0xd14   :  { %v570_v29 = vmul.f32 %v1140_v6, %v568_v28 }
 0xd15   :  { %597 = vrot.lane.b32.xlu1 %v595_v27, %s1230_s5 }
 0xd16   :  { %601 = vrot.lane.b32.xlu0 %v570_v29, %s1229_s4 }
 0xd19   :  { %77 = vperm.xlu1 %1060, %v47_v30  }
 0xd87   :  { %v598_v31 = vpop.permute.xlu1 %597 }
 0xd88   :  { %v602_v32 = vpop.permute.xlu0 %601 }
 0xd89   :  { %v604_v33 = vsel %vm142_vm0, %v598_v31, %v602_v32 }
 0xd8a   :  { %v605_v34 = vpack.c.bf16 %v604_v33, %v604_v33 }
 0xd8c   :  { %1039 = vmatmul.mubr.msk.bf16.vlgmr.msra.gmra.mrb[8].mxu0 %vm185_vm1, %v605_v34 }
 0xd8d   :  { %818 = vmatpush1.bf16.msra.mxu0 %v1290_v18  ;;  %849 = vmatprep.mubr.bf16.mxu0 %v1228_v0 }
 0xd8e   :  { %819 = vmatprep.subr.bf16.mxu0 %v1292_v19 }
 0xd91   :  { %820 = vmatpush1.bf16.msra.mxu0 %v1297_v20 }
 0xd92   :  { %821 = vmatprep.subr.bf16.mxu0 %v1301_v21 }
 0xd95   :  { %822 = vmatpush1.bf16.msra.mxu0 %v1305_v22 }
 0xd96   :  { %823 = vmatprep.subr.bf16.mxu0 %v1309_v23 }
 0xd98   :  { %v78_v36 = vpop.permute.xlu1 %77 }
 0xd99   :  { %824 = vmatpush1.bf16.msra.mxu0 %v1317_v25  ;;  %v99_v37 = vmul.f32 %v1274_v2, %v78_v36 }
 0xd9b   :  { %v111_v38 = vadd.f32 %v1279_v4, %v99_v37 }
 0xe5f   :  { %v643_v39 = vpop.f32.mrb[8].mxu0 }
 0xe60   :  { %v675_v40 = vadd.f32 %v643_v39, %v111_v38  ;;  %v645_v41 = vpop.f32.mrb[9].mxu0 }
 0xe61   :  { %v650_v42 = vadd.f32 %v1343_v35, %v645_v41  ;;  %v647_v43 = vpop.f32.mrb[10].mxu0 }
 0xe62   :  { %1145 = vtanh.f32 %v675_v40  ;;  %v648_v44 = vpop.f32.mrb[11].mxu0  ;;  %v1041_v47 = vmul.f32 -1.442695, %v675_v40 }
 0xe63   :  { %1147 = vtanh.f32 %v650_v42  ;;  %v1040_v48 = vmul.f32 -1.442695, %v650_v42 }
 0xe64   :  { %1149 = vpow2.f32 %v1041_v47 }
 0xe65   :  { %1151 = vpow2.f32 %v1040_v48 }
 0xe6c   :  { %v1146_v45 = vpop.eup %1145 }
 0xe6d   :  { %v1148_v46 = vpop.eup %1147  ;;  %685 = vrot.lane.b32.xlu1 %v1146_v45, %s1229_s4 }
 0xe6e   :  { %660 = vrot.lane.b32.xlu0 %v1148_v46, %s1229_s4  ;;  %v1150_v49 = vpop.eup %1149 }
 0xe6f   :  { %v1152_v50 = vpop.eup %1151  ;;  %v679_v51 = vadd.f32 1.0, %v1150_v49 }
 0xe70   :  { %v654_v52 = vadd.f32 1.0, %v1152_v50  ;;  %v49_v50 = vld [vmem:[%s1550_s0 + $0xe] sm:$0x3] }
 0xe71   :  { %1153 = vrcp.f32 %v679_v51 }
 0xe72   :  { %1155 = vrcp.f32 %v654_v52 }
 0xe7b   :  { %v1154_v53 = vpop.eup %1153 }
 0xe7c   :  { %v1156_v55 = vpop.eup %1155  ;;  %v683_v59 = vmul.f32 %v1154_v53, %v1450_v13 }
 0xe7d   :  { %v658_v60 = vmul.f32 %v1156_v55, %v1452_v15 }
 0xedf   :  { %v686_v54 = vpop.permute.xlu1 %685 }
 0xee0   :  { %v688_v56 = vmul.f32 %v1154_v53, %v686_v54  ;;  %v661_v57 = vpop.permute.xlu0 %660 }
 0xee1   :  { %v663_v58 = vmul.f32 %v1156_v55, %v661_v57 }
 0xee2   :  { %690 = vrot.lane.b32.xlu1 %v688_v56, %s1230_s5 }
 0xee3   :  { %665 = vrot.lane.b32.xlu0 %v663_v58, %s1230_s5 }
 0xf54   :  { %v691_v17 = vpop.permute.xlu1 %690 }
 0xf55   :  { %v1482_v61 = vadd.f32 %v691_v17, %v683_v59  ;;  %v666_v62 = vpop.permute.xlu0 %665 }
 0xf56   :  { %v1484_v63 = vadd.f32 %v666_v62, %v658_v60 }
 0xf57   :  { %1157 = vtanh.f32 %v1482_v61 }
 0xf58   :  { %1159 = vtanh.f32 %v1484_v63 }
 0xf61   :  { %v1158_v1 = vpop.eup %1157 }
 0xf62   :  { %v1160_v3 = vpop.eup %1159  ;;  %696 = vrot.lane.b32.xlu1 %v1158_v1, %s1229_s4 }
 0xf63   :  { %671 = vrot.lane.b32.xlu0 %v1160_v3, %s1229_s4 }
 0xfd4   :  { %v697_v5 = vpop.permute.xlu1 %696 }
 0xfd5   :  { %v699_v6 = vmul.f32 %v1154_v53, %v697_v5  ;;  %v672_v7 = vpop.permute.xlu0 %671 }
 0xfd6   :  { %v674_v8 = vmul.f32 %v1156_v55, %v672_v7 }
 0xfd7   :  { %701 = vrot.lane.b32.xlu0 %v699_v6, %s1230_s5 }
 0xfd8   :  { %705 = vrot.lane.b32.xlu1 %v674_v8, %s1229_s4 }
 0xfdb   :  { %82 = vperm.xlu0 %1059, %v48_v9  }
0x1049   :  { %v702_v10 = vpop.permute.xlu0 %701 }
0x104a   :  { %v706_v11 = vpop.permute.xlu1 %705 }
0x104b   :  { %v708_v12 = vsel %vm142_vm0, %v702_v10, %v706_v11 }
0x104c   :  { %v709_v13 = vpack.c.bf16 %v708_v12, %v708_v12 }
0x104e   :  { %1042 = vmatmul.mubr.msk.bf16.vlgmr.msra.gmra.mrb[8].mxu1 %vm185_vm1, %v709_v13 }
0x104f   :  { %922 = vmatpush1.bf16.msra.mxu1 %v1290_v18  ;;  %953 = vmatprep.mubr.bf16.mxu1 %v1228_v0 }
0x1050   :  { %923 = vmatprep.subr.bf16.mxu1 %v1292_v19 }
0x1053   :  { %924 = vmatpush1.bf16.msra.mxu1 %v1297_v20 }
0x1054   :  { %925 = vmatprep.subr.bf16.mxu1 %v1301_v21 }
0x1057   :  { %926 = vmatpush1.bf16.msra.mxu1 %v1305_v22 }
0x1058   :  { %927 = vmatprep.subr.bf16.mxu1 %v1309_v23 }
0x105a   :  { %v83_v14 = vpop.permute.xlu0 %82 }
0x105b   :  { %928 = vmatpush1.bf16.msra.mxu1 %v1317_v25  ;;  %v100_v15 = vmul.f32 %v1274_v2, %v83_v14 }
0x105d   :  { %v112_v16 = vadd.f32 %v1279_v4, %v100_v15 }
0x1121   :  { %v747_v18 = vpop.f32.mrb[8].mxu1 }
0x1122   :  { %v779_v24 = vadd.f32 %v747_v18, %v112_v16  ;;  %v749_v0 = vpop.f32.mrb[9].mxu1 }
0x1123   :  { %v754_v19 = vadd.f32 %v1343_v35, %v749_v0  ;;  %v751_v26 = vpop.f32.mrb[10].mxu1 }
0x1124   :  { %1161 = vtanh.f32 %v779_v24  ;;  %v752_v20 = vpop.f32.mrb[11].mxu1  ;;  %v1044_v23 = vmul.f32 -1.442695, %v779_v24 }
0x1125   :  { %1163 = vtanh.f32 %v754_v19  ;;  %v1043_v25 = vmul.f32 -1.442695, %v754_v19 }
0x1126   :  { %1165 = vpow2.f32 %v1044_v23 }
0x1127   :  { %1167 = vpow2.f32 %v1043_v25 }
0x112e   :  { %v1162_v21 = vpop.eup %1161 }
0x112f   :  { %v1164_v22 = vpop.eup %1163  ;;  %789 = vrot.lane.b32.xlu0 %v1162_v21, %s1229_s4 }
0x1130   :  { %764 = vrot.lane.b32.xlu1 %v1164_v22, %s1229_s4  ;;  %v1166_v27 = vpop.eup %1165 }
0x1131   :  { %v1168_v28 = vpop.eup %1167  ;;  %v783_v29 = vadd.f32 1.0, %v1166_v27 }
0x1132   :  { %v758_v30 = vadd.f32 1.0, %v1168_v28 }
0x1133   :  { %1169 = vrcp.f32 %v783_v29 }
0x1134   :  { %1171 = vrcp.f32 %v758_v30 }
0x113d   :  { %v1170_v31 = vpop.eup %1169 }
0x113e   :  { %v1172_v33 = vpop.eup %1171  ;;  %v787_v38 = vmul.f32 %v1170_v31, %v1482_v61 }
0x113f   :  { %v762_v40 = vmul.f32 %v1172_v33, %v1484_v63 }
0x11a1   :  { %v790_v32 = vpop.permute.xlu0 %789 }
0x11a2   :  { %v792_v34 = vmul.f32 %v1170_v31, %v790_v32  ;;  %v765_v36 = vpop.permute.xlu1 %764 }
0x11a3   :  { %v767_v37 = vmul.f32 %v1172_v33, %v765_v36 }
0x11a4   :  { %794 = vrot.lane.b32.xlu0 %v792_v34, %s1230_s5 }
0x11a5   :  { %769 = vrot.lane.b32.xlu1 %v767_v37, %s1230_s5 }
0x1216   :  { %v795_v39 = vpop.permute.xlu0 %794 }
0x1217   :  { %v797_v41 = vadd.f32 %v795_v39, %v787_v38  ;;  %v770_v42 = vpop.permute.xlu1 %769 }
0x1218   :  { %v772_v43 = vadd.f32 %v770_v42, %v762_v40 }
0x1219   :  { %1173 = vtanh.f32 %v797_v41 }
0x121a   :  { %1175 = vtanh.f32 %v772_v43 }
0x1223   :  { %v1174_v44 = vpop.eup %1173 }
0x1224   :  { %v1176_v45 = vpop.eup %1175  ;;  %800 = vrot.lane.b32.xlu0 %v1174_v44, %s1229_s4 }
0x1225   :  { %775 = vrot.lane.b32.xlu1 %v1176_v45, %s1229_s4 }
0x1296   :  { %v801_v46 = vpop.permute.xlu0 %800 }
0x1297   :  { %v803_v47 = vmul.f32 %v1170_v31, %v801_v46  ;;  %v776_v48 = vpop.permute.xlu1 %775 }
0x1298   :  { %v778_v49 = vmul.f32 %v1172_v33, %v776_v48 }
0x1299   :  { %805 = vrot.lane.b32.xlu1 %v803_v47, %s1230_s5 }
0x129a   :  { %809 = vrot.lane.b32.xlu0 %v778_v49, %s1229_s4 }
0x129d   :  { %87 = vperm.xlu1 %1060, %v49_v50  }
0x130b   :  { %v806_v51 = vpop.permute.xlu1 %805 }
0x130c   :  { %v810_v52 = vpop.permute.xlu0 %809 }
0x130d   :  { %v812_v53 = vsel %vm142_vm0, %v806_v51, %v810_v52 }
0x130e   :  { %v813_v54 = vpack.c.bf16 %v812_v53, %v812_v53  ;;  %v1051_v53 = vld [vmem:[%s1552_s2 + $0x4] ss:$0 sm:$0xff] }
0x1310   :  { %1045 = vmatmul.mubr.msk.bf16.vlgmr.msra.gmra.mrb[12].mxu0 %vm185_vm1, %v813_v54 }
0x131c   :  { %v88_v55 = vpop.permute.xlu1 %87 }
0x131d   :  { %v101_v56 = vmul.f32 %v1274_v2, %v88_v55 }
0x131f   :  { %v113_v57 = vadd.f32 %v1279_v4, %v101_v56 }
0x13e3   :  { %v851_v58 = vpop.f32.mrb[12].mxu0 }
0x13e4   :  { %v883_v59 = vadd.f32 %v851_v58, %v113_v57  ;;  %v853_v17 = vpop.f32.mrb[13].mxu0 }
0x13e5   :  { %v858_v60 = vadd.f32 %v1343_v35, %v853_v17  ;;  %v855_v61 = vpop.f32.mrb[14].mxu0 }
0x13e6   :  { %1177 = vtanh.f32 %v883_v59  ;;  %v856_v62 = vpop.f32.mrb[15].mxu0  ;;  %v1047_v3 = vmul.f32 -1.442695, %v883_v59 }
0x13e7   :  { %1179 = vtanh.f32 %v858_v60  ;;  %v1046_v5 = vmul.f32 -1.442695, %v858_v60 }
0x13e8   :  { %1181 = vpow2.f32 %v1047_v3 }
0x13e9   :  { %1183 = vpow2.f32 %v1046_v5 }
0x13f0   :  { %v1178_v63 = vpop.eup %1177 }
0x13f1   :  { %v1180_v1 = vpop.eup %1179  ;;  %893 = vrot.lane.b32.xlu1 %v1178_v63, %s1229_s4 }
0x13f2   :  { %868 = vrot.lane.b32.xlu0 %v1180_v1, %s1229_s4  ;;  %v1182_v2 = vpop.eup %1181 }
0x13f3   :  { %v1184_v4 = vpop.eup %1183  ;;  %v887_v6 = vadd.f32 1.0, %v1182_v2 }
0x13f4   :  { %v862_v7 = vadd.f32 1.0, %v1184_v4 }
0x13f5   :  { %1185 = vrcp.f32 %v887_v6 }
0x13f6   :  { %1187 = vrcp.f32 %v862_v7 }
0x13ff   :  { %v1186_v8 = vpop.eup %1185 }
0x1400   :  { %v1188_v10 = vpop.eup %1187  ;;  %v891_v14 = vmul.f32 %v1186_v8, %v797_v41 }
0x1401   :  { %v866_v16 = vmul.f32 %v1188_v10, %v772_v43 }
0x1463   :  { %v894_v9 = vpop.permute.xlu1 %893 }
0x1464   :  { %v896_v11 = vmul.f32 %v1186_v8, %v894_v9  ;;  %v869_v12 = vpop.permute.xlu0 %868 }
0x1465   :  { %v871_v13 = vmul.f32 %v1188_v10, %v869_v12 }
0x1466   :  { %898 = vrot.lane.b32.xlu1 %v896_v11, %s1230_s5 }
0x1467   :  { %873 = vrot.lane.b32.xlu0 %v871_v13, %s1230_s5 }
0x14d8   :  { %v899_v15 = vpop.permute.xlu1 %898 }
0x14d9   :  { %v901_v18 = vadd.f32 %v899_v15, %v891_v14  ;;  %v874_v24 = vpop.permute.xlu0 %873 }
0x14da   :  { %v876_v0 = vadd.f32 %v874_v24, %v866_v16 }
0x14db   :  { %1189 = vtanh.f32 %v901_v18 }
0x14dc   :  { %1191 = vtanh.f32 %v876_v0 }
0x14e5   :  { %v1190_v19 = vpop.eup %1189 }
0x14e6   :  { %v1192_v26 = vpop.eup %1191  ;;  %904 = vrot.lane.b32.xlu1 %v1190_v19, %s1229_s4 }
0x14e7   :  { %879 = vrot.lane.b32.xlu0 %v1192_v26, %s1229_s4 }
0x1558   :  { %v905_v20 = vpop.permute.xlu1 %904 }
0x1559   :  { %v907_v21 = vmul.f32 %v1186_v8, %v905_v20  ;;  %v880_v22 = vpop.permute.xlu0 %879 }
0x155a   :  { %v882_v23 = vmul.f32 %v1188_v10, %v880_v22 }
0x155b   :  { %909 = vrot.lane.b32.xlu0 %v907_v21, %s1230_s5 }
0x155c   :  { %913 = vrot.lane.b32.xlu1 %v882_v23, %s1229_s4 }
0x15cd   :  { %v910_v25 = vpop.permute.xlu0 %909 }
0x15ce   :  { %v914_v27 = vpop.permute.xlu1 %913 }
0x15cf   :  { %v916_v28 = vsel %vm142_vm0, %v910_v25, %v914_v27 }
0x15d0   :  { %v917_v29 = vpack.c.bf16 %v916_v28, %v916_v28 }
0x15d2   :  { %1048 = vmatmul.mubr.msk.bf16.vlgmr.msra.gmra.mrb[12].mxu1 %vm185_vm1, %v917_v29 }
0x16a5   :  { %v955_v30 = vpop.f32.mrb[12].mxu1 }
0x16a6   :  { %v956_v31 = vpop.f32.mrb[13].mxu1 }
0x16a7   :  { %v961_v32 = vadd.f32 %v1343_v35, %v956_v31  ;;  %v958_v33 = vpop.f32.mrb[14].mxu1  ;;  %v1050_v35 = vld [vmem:[%s1552_s2 + $0x3] ss:$0 sm:$0xff] }
0x16a8   :  { %v959_v34 = vpop.f32.mrb[15].mxu1 }
0x16a9   :  { %1193 = vtanh.f32 %v961_v32  ;;  %v1049_v37 = vmul.f32 -1.442695, %v961_v32 }
0x16ab   :  { %1195 = vpow2.f32 %v1049_v37 }
0x16b3   :  { %v1194_v36 = vpop.eup %1193 }
0x16b4   :  { %971 = vrot.lane.b32.xlu0 %v1194_v36, %s1229_s4 }
0x16b5   :  { %v1196_v38 = vpop.eup %1195 }
0x16b6   :  { %v965_v39 = vadd.f32 1.0, %v1196_v38 }
0x16b8   :  { %1197 = vrcp.f32 %v965_v39 }
0x16c2   :  { %v1198_v40 = vpop.eup %1197 }
0x16c3   :  { %v969_v43 = vmul.f32 %v1198_v40, %v876_v0 }
0x1726   :  { %v972_v41 = vpop.permute.xlu0 %971 }
0x1727   :  { %v974_v42 = vmul.f32 %v1198_v40, %v972_v41 }
0x1729   :  { %976 = vrot.lane.b32.xlu1 %v974_v42, %s1230_s5 }
0x172d   :  { %991 = vrot.lane.b32.xlu1 %v1050_v35, %s1231_s23 }
0x179b   :  { %v977_v44 = vpop.permute.xlu1 %976 }
0x179c   :  { %v979_v45 = vadd.f32 %v977_v44, %v969_v43 }
0x179e   :  { %1199 = vtanh.f32 %v979_v45 }
0x179f   :  { %v992_v48 = vpop.permute.xlu1 %991 }
0x17a8   :  { %v1200_v46 = vpop.eup %1199 }
0x17a9   :  { %982 = vrot.lane.b32.xlu0 %v1200_v46, %s1229_s4 }
0x181b   :  { %v983_v47 = vpop.permute.xlu0 %982 }
0x181c   :  { %v985_v49 = vmul.f32 %v1198_v40, %v983_v47 }
0x181e   :  { %v994_v50 = vmul.f32 %v992_v48, %v985_v49 }
0x1820   :  { %996 = vrot.lane.b32.xlu0 %v994_v50, %s1230_s5 }
0x1892   :  { %v997_v51 = vpop.permute.xlu0 %996 }
0x1893   :  { %v1000_v52 = vsel %vm999_vm2, %v997_v51, 0.0 }
0x1894   :  { %1001 = vadd.xlane.f32.xlu1 %v1000_v52 }
0x1921   :  { %v1002_v54 = vpop.xlane.xlu1 %1001 }
0x1922   :  { %v1007_v55 = vadd.f32 %v1051_v53, %v1002_v54 }
0x1924   :  { %1009 = vst.msk [vmem:[%s1553_s3] sm:$0x3] %vm1008_vm3, %v1007_v55 }
0x1925   :  { %1014 = vsyncpa [#allocation3], 1 }

</bundles_post_ra>
